<compile_context>
chip_gen: v7x
topology: tpu7x:2x2x1
jax: 0.10.0
libtpu: 0.0.40
codegen_flags: <defaults>
</compile_context>

<pallas_src>
import jax
import jax.numpy as jnp
from jax import lax
from jax.experimental import pallas as pl
from jax.experimental.pallas import tpu as pltpu


# ----------------------------------------------------------------------------
# Exact (erf-based) GELU, matching torch.nn.GELU() default (approximate='none').
# erf is the f32 rational polynomial XLA uses (clamped rational approximation);
# the final divide is replaced by an EUP reciprocal + one Newton refinement.
# ----------------------------------------------------------------------------
_ERF_ALPHA = (0.00022905065861350646, 0.0034082910107109506, 0.050955695062380861,
              0.18520832239976145, 1.128379143519084)
_ERF_BETA = (-1.1791602954361697e-07, 2.3547966471313185e-05, 0.0010179625278914885,
             0.014070470171167667, 0.11098505178285362, 0.49746925110067538, 1.0)


def _erf_f32(x):
    x = jnp.clip(x, -4.0, 4.0)
    x2 = x * x
    p = jnp.full(x2.shape, _ERF_ALPHA[0], x2.dtype)
    for c in _ERF_ALPHA[1:]:
        p = p * x2 + jnp.float32(c)
    q = jnp.full(x2.shape, _ERF_BETA[0], x2.dtype)
    for c in _ERF_BETA[1:]:
        q = q * x2 + jnp.float32(c)
    # f32 divide is a long VALU sequence; approx reciprocal uses the otherwise-idle
    # EUP slot.  One Newton step (2 cheap VPU ops) restores ~full f32 accuracy.
    r = pl.reciprocal(q, approx=True)
    r = r * (2.0 - q * r)
    return x * p * r


def _gelu_exact(x):
    return 0.5 * x * (1.0 + _erf_f32(x * 0.7071067811865476))


# ----------------------------------------------------------------------------
# Kernel: one grid step per block of `block_b` images; all G groups fused.
#   x_ref  : (block_b, C, N)   pixels, N in lanes
#   w1_ref : (G*F, C)          fused conv1 weight (all groups stacked on rows)
#   b1_ref : (G*F, 1)
#   w2_ref : (G, G*F)          block-diagonal conv2 weight, pre-scaled by 1/N
#   b2_ref : (G, 1)            conv2 bias, pre-scaled by 1/N
#   o_ref  : (block_b, C, G)
# ----------------------------------------------------------------------------
def _token_learner_kernel(x_ref, w1_ref, b1_ref, w2_ref, b2_ref, o_ref):
    block_b = x_ref.shape[0]
    # Hoist the small weight/bias loads out of the per-image unrolled loop.
    w1 = w1_ref[...]
    b1 = b1_ref[...]
    w2 = w2_ref[...]
    b2 = b2_ref[...]

    for bb in range(block_b):                         # static, small unroll
        x = x_ref[bb]                                 # (C, N)
        # grouped 1x1 conv #1, all groups in one matmul, + exact GELU (lane-dense)
        h = jnp.dot(w1, x, preferred_element_type=jnp.float32) + b1      # (G*F, N)
        h = _gelu_exact(h)
        # grouped 1x1 conv #2 via block-diagonal weight (1/N mean already folded in)
        a = jnp.dot(w2, h, preferred_element_type=jnp.float32) + b2      # (G, N)
        # out[c, g] = sum_n x[c, n] * a[g, n]  -> single (C, G) tile, one dense store
        out = lax.dot_general(x, a, (((1,), (1,)), ((), ())),
                              preferred_element_type=jnp.float32)        # (C, G)
        o_ref[bb] = out.astype(o_ref.dtype)


def _pick_block_b(batch, max_fold=8):
    """Fold images per grid step to amortize ~0.35us/step pipeline overhead, but
    keep >= 2 grid steps so both v7x TensorCores get work (no-op on v5e/v6e)."""
    best = 1
    for bt in range(1, min(max_fold, batch) + 1):
        if batch % bt == 0 and batch // bt >= 2:
            best = bt
    return best


def token_learner(x_nchw, params, *, block_b=None):
    """x_nchw: (B, C, H, W) float32. Returns (B, C, G)."""
    w1, b1, w2, b2 = params            # (G,C,F), (G,1,F), (G,F,1), (G,1,1)
    B, C, H, W = x_nchw.shape
    N = H * W
    G, _, F = w1.shape

    # Pure reshape (no HBM transpose): N = H*W stays in the lane dimension.
    x = x_nchw.reshape(B, C, N)

    # Trace-time weight fusion (tiny constants, prepared once outside the hot path).
    # conv1: rows g*F..g*F+F-1 hold group g's (F, C) weight.
    w1_all = jnp.transpose(w1, (0, 2, 1)).reshape(G * F, C)
    b1_all = jnp.reshape(b1, (G * F, 1))
    # conv2: exact block-diagonal (G, G*F); off-diagonal blocks are exactly zero.
    inv_n = jnp.float32(1.0 / N)
    w2_bd = (jnp.eye(G, dtype=w2.dtype)[:, :, None] * w2[None, :, :, 0]).reshape(G, G * F)
    w2_bd = w2_bd * inv_n              # fold the 1/N mean into the weight ...
    b2_all = jnp.reshape(b2, (G, 1)) * inv_n   # ... and the bias.

    if block_b is None:
        block_b = _pick_block_b(B)
    assert B % block_b == 0, (B, block_b)
    grid = (B // block_b,)

    flops = 2 * B * N * (G * F * C + G * (G * F) + C * G)
    cost = pl.CostEstimate(
        flops=flops,
        transcendentals=B * N * G * F,  # one EUP reciprocal per GELU element
        bytes_accessed=4 * (B * C * N + B * C * G + G * F * C + G * F + G * G * F + G),
    )

    return pl.pallas_call(
        _token_learner_kernel,
        out_shape=jax.ShapeDtypeStruct((B, C, G), x.dtype),
        grid=grid,
        in_specs=[
            pl.BlockSpec((block_b, C, N), lambda b: (b, 0, 0)),
            pl.BlockSpec(w1_all.shape, lambda b: (0, 0)),
            pl.BlockSpec(b1_all.shape, lambda b: (0, 0)),
            pl.BlockSpec(w2_bd.shape, lambda b: (0, 0)),
            pl.BlockSpec(b2_all.shape, lambda b: (0, 0)),
        ],
        out_specs=pl.BlockSpec((block_b, C, G), lambda b: (b, 0, 0)),
        compiler_params=pltpu.CompilerParams(dimension_semantics=("parallel",)),
        cost_estimate=cost,
    )(x, w1_all, b1_all, w2_bd, b2_all)


# ----------------------------------------------------------------------------
# Pure-JAX reference (same math, used only for a sanity check).
# ----------------------------------------------------------------------------
def token_learner_ref(x_nchw, w1, b1, w2, b2):
    B, C, H, W = x_nchw.shape
    xp = jnp.transpose(x_nchw, (0, 2, 3, 1)).reshape(B, H * W, C)
    h = jnp.einsum('bnc,gcf->bgnf', xp, w1) + b1[None]
    h = jax.nn.gelu(h, approximate=False)
    a = jnp.einsum('bgnf,gfo->bgno', h, w2) + b2[None]
    return jnp.einsum('bnc,bgn->bcg', xp, a[..., 0]) / (H * W)


if __name__ == "__main__":
    # Module config: dim=4 (=C), ff_mult=2, num_output_tokens=8  ->  F = dim*ff_mult = 8
    B, C, H, W = 2, 4, 16, 16
    G, FF_MULT = 8, 2
    F = C * FF_MULT

    key = jax.random.PRNGKey(0)
    kx, k1, k2, k3, k4 = jax.random.split(key, 5)
    x = jax.random.normal(kx, (B, C, H, W), jnp.float32)

    # Deterministic synthetic parameters.
    # PyTorch conv1 weight is (G*F, C, 1, 1); group g slice (F, C) -> stored here as w1[g] = (C, F).
    # PyTorch conv2 weight is (G, F, 1, 1); group g slice (F,)     -> stored here as w2[g] = (F, 1).
    w1 = jax.random.normal(k1, (G, C, F), jnp.float32) * 0.1
    b1 = jax.random.normal(k2, (G, 1, F), jnp.float32) * 0.01
    w2 = jax.random.normal(k3, (G, F, 1), jnp.float32) * 0.1
    b2 = jax.random.normal(k4, (G, 1, 1), jnp.float32) * 0.01

    out = token_learner(x, (w1, b1, w2, b2))
    out = jax.block_until_ready(out)
    assert out.shape == (B, C, G), out.shape

    ref = token_learner_ref(x, w1, b1, w2, b2)
    err = float(jnp.max(jnp.abs(out - ref)))
    if err > 1e-3:
        raise AssertionError(f"kernel/reference mismatch: max abs err = {err}")

    print("KERNEL_OK")
</pallas_src>

<mosaic_0001>
module attributes {stable_mosaic.version = 11 : i64} {
  func.func @_token_learner_kernel(%arg0: i32, %arg1: memref<1x4x256xf32, #tpu.memory_space<vmem>>, %arg2: memref<64x4xf32, #tpu.memory_space<vmem>>, %arg3: memref<64x1xf32, #tpu.memory_space<vmem>>, %arg4: memref<8x64xf32, #tpu.memory_space<vmem>>, %arg5: memref<8x1xf32, #tpu.memory_space<vmem>>, %arg6: memref<1x4x8xf32, #tpu.memory_space<vmem>>) attributes {dimension_semantics = [#tpu.dimension_semantics<parallel>], iteration_bounds = array<i64: 2>, scalar_prefetch = 0 : i64, scratch_operands = 0 : i64, tpu.core_type = #tpu.core_type<tc>, window_params = [{transform_indices = @transform_0, window_bounds = array<i64: 1, 4, 256>}, {pipeline_mode = #tpu.pipeline_mode<synchronous>, transform_indices = @transform_1, window_bounds = array<i64: 64, 4>}, {pipeline_mode = #tpu.pipeline_mode<synchronous>, transform_indices = @transform_2, window_bounds = array<i64: 64, 1>}, {pipeline_mode = #tpu.pipeline_mode<synchronous>, transform_indices = @transform_3, window_bounds = array<i64: 8, 64>}, {pipeline_mode = #tpu.pipeline_mode<synchronous>, transform_indices = @transform_4, window_bounds = array<i64: 8, 1>}, {transform_indices = @transform_5, window_bounds = array<i64: 1, 4, 8>}]} {
    %c0 = arith.constant 0 : index
    %c0_0 = arith.constant 0 : index
    %0 = vector.load %arg2[%c0, %c0_0] : memref<64x4xf32, #tpu.memory_space<vmem>>, vector<64x4xf32>
    %c0_1 = arith.constant 0 : index
    %c0_2 = arith.constant 0 : index
    %1 = vector.load %arg3[%c0_1, %c0_2] : memref<64x1xf32, #tpu.memory_space<vmem>>, vector<64x1xf32>
    %c0_3 = arith.constant 0 : index
    %c0_4 = arith.constant 0 : index
    %2 = vector.load %arg4[%c0_3, %c0_4] : memref<8x64xf32, #tpu.memory_space<vmem>>, vector<8x64xf32>
    %c0_5 = arith.constant 0 : index
    %c0_6 = arith.constant 0 : index
    %3 = vector.load %arg5[%c0_5, %c0_6] : memref<8x1xf32, #tpu.memory_space<vmem>>, vector<8x1xf32>
    %c0_7 = arith.constant 0 : index
    %c0_8 = arith.constant 0 : index
    %c0_9 = arith.constant 0 : index
    %4 = vector.load %arg1[%c0_7, %c0_8, %c0_9] : memref<1x4x256xf32, #tpu.memory_space<vmem>>, vector<1x4x256xf32>
    %5 = vector.shape_cast %4 : vector<1x4x256xf32> to vector<4x256xf32>
    %cst = arith.constant dense<0.000000e+00> : vector<64x256xf32>
    %6 = tpu.matmul %0, %5, %cst {dimension_numbers = #tpu.dot_dimension_numbers<[1], [0], [0], [1], [0, 0, 1, 1], [], []>} : vector<64x4xf32>, vector<4x256xf32>, vector<64x256xf32> -> vector<64x256xf32>
    %7 = vector.broadcast %1 : vector<64x1xf32> to vector<64x256xf32>
    %8 = arith.addf %6, %7 : vector<64x256xf32>
    %cst_10 = arith.constant 5.000000e-01 : f32
    %9 = vector.broadcast %cst_10 : f32 to vector<64x256xf32>
    %10 = arith.mulf %9, %8 : vector<64x256xf32>
    %cst_11 = arith.constant 0.707106769 : f32
    %11 = vector.broadcast %cst_11 : f32 to vector<64x256xf32>
    %12 = arith.mulf %8, %11 : vector<64x256xf32>
    %cst_12 = arith.constant -4.000000e+00 : f32
    %cst_13 = arith.constant 4.000000e+00 : f32
    %13 = vector.broadcast %cst_12 : f32 to vector<64x256xf32>
    %14 = arith.maximumf %13, %12 : vector<64x256xf32>
    %15 = vector.broadcast %cst_13 : f32 to vector<64x256xf32>
    %16 = arith.minimumf %15, %14 : vector<64x256xf32>
    %17 = arith.mulf %16, %16 : vector<64x256xf32>
    %cst_14 = arith.constant 2.29050653E-4 : f32
    %18 = vector.broadcast %cst_14 : f32 to vector<64x256xf32>
    %19 = arith.mulf %18, %17 : vector<64x256xf32>
    %cst_15 = arith.constant 0.00340829091 : f32
    %20 = vector.broadcast %cst_15 : f32 to vector<64x256xf32>
    %21 = arith.addf %19, %20 : vector<64x256xf32>
    %22 = arith.mulf %21, %17 : vector<64x256xf32>
    %cst_16 = arith.constant 0.0509556942 : f32
    %23 = vector.broadcast %cst_16 : f32 to vector<64x256xf32>
    %24 = arith.addf %22, %23 : vector<64x256xf32>
    %25 = arith.mulf %24, %17 : vector<64x256xf32>
    %cst_17 = arith.constant 0.185208321 : f32
    %26 = vector.broadcast %cst_17 : f32 to vector<64x256xf32>
    %27 = arith.addf %25, %26 : vector<64x256xf32>
    %28 = arith.mulf %27, %17 : vector<64x256xf32>
    %cst_18 = arith.constant 1.12837911 : f32
    %29 = vector.broadcast %cst_18 : f32 to vector<64x256xf32>
    %30 = arith.addf %28, %29 : vector<64x256xf32>
    %cst_19 = arith.constant -1.17916031E-7 : f32
    %31 = vector.broadcast %cst_19 : f32 to vector<64x256xf32>
    %32 = arith.mulf %31, %17 : vector<64x256xf32>
    %cst_20 = arith.constant 2.35479656E-5 : f32
    %33 = vector.broadcast %cst_20 : f32 to vector<64x256xf32>
    %34 = arith.addf %32, %33 : vector<64x256xf32>
    %35 = arith.mulf %34, %17 : vector<64x256xf32>
    %cst_21 = arith.constant 0.00101796258 : f32
    %36 = vector.broadcast %cst_21 : f32 to vector<64x256xf32>
    %37 = arith.addf %35, %36 : vector<64x256xf32>
    %38 = arith.mulf %37, %17 : vector<64x256xf32>
    %cst_22 = arith.constant 0.0140704699 : f32
    %39 = vector.broadcast %cst_22 : f32 to vector<64x256xf32>
    %40 = arith.addf %38, %39 : vector<64x256xf32>
    %41 = arith.mulf %40, %17 : vector<64x256xf32>
    %cst_23 = arith.constant 0.110985048 : f32
    %42 = vector.broadcast %cst_23 : f32 to vector<64x256xf32>
    %43 = arith.addf %41, %42 : vector<64x256xf32>
    %44 = arith.mulf %43, %17 : vector<64x256xf32>
    %cst_24 = arith.constant 0.497469246 : f32
    %45 = vector.broadcast %cst_24 : f32 to vector<64x256xf32>
    %46 = arith.addf %44, %45 : vector<64x256xf32>
    %47 = arith.mulf %46, %17 : vector<64x256xf32>
    %cst_25 = arith.constant 1.000000e+00 : f32
    %48 = vector.broadcast %cst_25 : f32 to vector<64x256xf32>
    %49 = arith.addf %47, %48 : vector<64x256xf32>
    %50 = tpu.reciprocal %49 {approx = true} : vector<64x256xf32> -> vector<64x256xf32>
    %51 = arith.mulf %49, %50 : vector<64x256xf32>
    %cst_26 = arith.constant 2.000000e+00 : f32
    %52 = vector.broadcast %cst_26 : f32 to vector<64x256xf32>
    %53 = arith.subf %52, %51 : vector<64x256xf32>
    %54 = arith.mulf %50, %53 : vector<64x256xf32>
    %55 = arith.mulf %16, %30 : vector<64x256xf32>
    %56 = arith.mulf %55, %54 : vector<64x256xf32>
    %cst_27 = arith.constant 1.000000e+00 : f32
    %57 = vector.broadcast %cst_27 : f32 to vector<64x256xf32>
    %58 = arith.addf %57, %56 : vector<64x256xf32>
    %59 = arith.mulf %10, %58 : vector<64x256xf32>
    %cst_28 = arith.constant dense<0.000000e+00> : vector<8x256xf32>
    %60 = tpu.matmul %2, %59, %cst_28 {dimension_numbers = #tpu.dot_dimension_numbers<[1], [0], [0], [1], [0, 0, 1, 1], [], []>} : vector<8x64xf32>, vector<64x256xf32>, vector<8x256xf32> -> vector<8x256xf32>
    %61 = vector.broadcast %3 : vector<8x1xf32> to vector<8x256xf32>
    %62 = arith.addf %60, %61 : vector<8x256xf32>
    %cst_29 = arith.constant dense<0.000000e+00> : vector<4x8xf32>
    %63 = tpu.matmul %5, %62, %cst_29 {dimension_numbers = #tpu.dot_dimension_numbers<[1], [1], [0], [0], [0, 0, 1, 0], [], []>} : vector<4x256xf32>, vector<8x256xf32>, vector<4x8xf32> -> vector<4x8xf32>
    %c0_30 = arith.constant 0 : index
    %c0_31 = arith.constant 0 : index
    %c0_32 = arith.constant 0 : index
    %64 = vector.load %arg6[%c0_30, %c0_31, %c0_32] : memref<1x4x8xf32, #tpu.memory_space<vmem>>, vector<1x4x8xf32>
    %65 = vector.shape_cast %64 : vector<1x4x8xf32> to vector<4x8xf32>
    %66 = vector.shape_cast %63 : vector<4x8xf32> to vector<1x4x8xf32>
    tpu.vector_store %arg6[%c0_30, %c0_31, %c0_32], %66 {strides = array<i32>} : memref<1x4x8xf32, #tpu.memory_space<vmem>>, vector<1x4x8xf32>,
    return
  }
  func.func @transform_0(%arg0: i32) -> (i32, i32, i32) {
    %c0_i32 = arith.constant 0 : i32
    %c0_i32_0 = arith.constant 0 : i32
    %c0_i32_1 = arith.constant 0 : i32
    return %arg0, %c0_i32, %c0_i32_0 : i32, i32, i32
  }
  func.func @transform_1(%arg0: i32) -> (i32, i32) {
    %c0_i32 = arith.constant 0 : i32
    %c0_i32_0 = arith.constant 0 : i32
    %c0_i32_1 = arith.constant 0 : i32
    return %c0_i32, %c0_i32_0 : i32, i32
  }
  func.func @transform_2(%arg0: i32) -> (i32, i32) {
    %c0_i32 = arith.constant 0 : i32
    %c0_i32_0 = arith.constant 0 : i32
    %c0_i32_1 = arith.constant 0 : i32
    return %c0_i32, %c0_i32_0 : i32, i32
  }
  func.func @transform_3(%arg0: i32) -> (i32, i32) {
    %c0_i32 = arith.constant 0 : i32
    %c0_i32_0 = arith.constant 0 : i32
    %c0_i32_1 = arith.constant 0 : i32
    return %c0_i32, %c0_i32_0 : i32, i32
  }
  func.func @transform_4(%arg0: i32) -> (i32, i32) {
    %c0_i32 = arith.constant 0 : i32
    %c0_i32_0 = arith.constant 0 : i32
    %c0_i32_1 = arith.constant 0 : i32
    return %c0_i32, %c0_i32_0 : i32, i32
  }
  func.func @transform_5(%arg0: i32) -> (i32, i32, i32) {
    %c0_i32 = arith.constant 0 : i32
    %c0_i32_0 = arith.constant 0 : i32
    %c0_i32_1 = arith.constant 0 : i32
    return %arg0, %c0_i32, %c0_i32_0 : i32, i32, i32
  }
}

</mosaic_0001>

<bundles_post_ra>
// kernel: tpu_custom_call.1
= control target key start
LH: loop header
LB: loop body
LE: loop exit
PB: predicated region body
PF: predicated region fallthrough
CT: control target
= control target key end

     0   :  { %10 = vsyncpa [#allocation3], 0  ;;  %s2061_s0 = inlined_call_operand.vmem [shape: f32[2,4,256], index: 0, kind: input, shape index: {}]   ;;  %s2062_s1 = inlined_call_operand.vmem [shape: f32[64,4], index: 1, kind: input, shape index: {}]   ;;  %s2063_s2 = inlined_call_operand.vmem [shape: f32[64,1], index: 2, kind: input, shape index: {}]   ;;  %s2064_s3 = inlined_call_operand.vmem [shape: f32[8,64], index: 3, kind: input, shape index: {}]   ;;  %s2065_s4 = inlined_call_operand.vmem [shape: f32[8,1], index: 4, kind: input, shape index: {}]   ;;  %s2066_s5 = inlined_call_operand.hbm [shape: f32[2,4,8], index: 5, kind: output, shape index: {}]  }
   0x1   :  { %12 = vsyncpa [#allocation3 + $0x1], 0  ;;  %s1410_s18 = smov 0   ;;  %s1412_s19 = smov 0  }
   0x2   :  { %s1414_s20 = smov 0   ;;  %s1416_s21 = smov 0  }
   0x3 LB: > { %s1431_s22 = sadd.s32 4294967295, %s1375_s21   ;;  %s1181_s23 = sadd.s32 4294967294, %s1375_s21   ;;  %s1375_s21 = sphi %s1416_s21, %s2099_s21   ;;  %s1371_s20 = sphi %s1414_s20, %s2098_s20   ;;  %s1367_s19 = sphi %s1412_s19, %s2097_s19   ;;  %s1363_s18 = sphi %s1410_s18, %s2096_s18  }
   0x4   : > { %s1435_s24 = sadd.s32 1, %s1375_s21   ;;  %s135_s25 = sadd.s32 1, %s1371_s20 }
   0x5   : > { %s132_s26 = ssub.s32 %s1375_s21, %s1435_s24  ;;  %p145_p0 = scmp.ne.s32.totalorder %s1371_s20, %s1367_s19 }
   0x6   : > { %p133_p1 = scmp.eq.s32.totalorder %s132_s26, 0  ;;  %p146_p2 = scmp.eq.s32.totalorder %s1431_s22, 1 }
   0x7   : > { %p151_p3 = scmp.ne.s32.totalorder %s1367_s19, %s1363_s18  ;;  %p152_p4 = scmp.eq.s32.totalorder %s1181_s23, 1 }
   0x8   : > { %s1446_s27 = scalar_select %p133_p1, %s1371_s20, %s135_s25  }
   0x9   : > { %p1448_p5 = por %p146_p2, %p145_p0  ;;  %p1452_p6 = por %p152_p4, %p151_p3 }
   0xa   : > { %p1184_p7 = scmp.ge.s32.totalorder %s1375_s21, 1  ;;  %p190_p8 = scmp.lt.s32.totalorder %s1375_s21, 3 }
   0xc   : > { %p191_p9 = pnand %p1184_p7, %p190_p8 }
   0xe   : > { %194 = sbr.rel (%p191_p9) target bundleno = 860 (0x35c), region = 40 }
  0x15   : > { %p218_p10 = scmp.lt.s32.totalorder %s1431_s22, 1  ;;  %v1377_v0 = vmov 0.0   ;;  %v1378_v1 = vmov 0   ;;  %v231_v2 = vld [vmem:[%s2063_s2] sm:$0xff]  ;;  %v233_v3 = vld [vmem:[%s2063_s2 + $0x10] sm:$0xff]  ;;  %v232_v4 = vld [vmem:[%s2063_s2 + $0x8] sm:$0xff] }
  0x16   : > { %378 = vmatprep.mubr.f32.mxu0 %v1377_v0  ;;  %1028 = vmatprep.mubr.f32.mxu1 %v1377_v0  ;;  %v234_v5 = vld [vmem:[%s2063_s2 + $0x18] sm:$0xff]  ;;  %vm309_vm0 = vcmask 1043456   ;;  %v223_v8 = vld [vmem:[%s2062_s1] sm:$0xff]  ;;  %vm284_vm1 = vcmask 31744   ;;  %v236_v10 = vld [vmem:[%s2063_s2 + $0x28] sm:$0xff]  ;;  %vm960_vm2 = vcmask 523264  }
  0x17   : > { %s219_s30 = scalar_select %p218_p10, %s1431_s22, 1  ;;  %1277 = vset.pattern.permute.xlu0 %v1378_v1  ;;  %1278 = vset.pattern.permute.xlu1 %v1378_v1  ;;  %v235_v9 = vld [vmem:[%s2063_s2 + $0x20] sm:$0xff]  ;;  %v224_v11 = vld [vmem:[%s2062_s1 + $0x8] sm:$0xff]  ;;  %v237_v12 = vld [vmem:[%s2063_s2 + $0x30] sm:$0xff]  ;;  %vm1106_vm3 = vcmask 60416  }
  0x18   : > { %244 = vperm.xlu0 %1277, %v231_v2   ;;  %254 = vperm.xlu1 %1278, %v233_v3   ;;  %v238_v13 = vld [vmem:[%s2063_s2 + $0x38] sm:$0xff]  ;;  %v225_v14 = vld [vmem:[%s2062_s1 + $0x10] sm:$0xff]  ;;  %v240_v15 = vld [vmem:[%s2065_s4] sm:$0xff]  ;;  %s215_s16 = sand.u32 1, %s1367_s19   ;;  %s1216_s23 = sshll.u32 %s1431_s22, 6 }
  0x19   : > { %s1219_s10 = sshll.u32 %s219_s30, 3  ;;  %v226_v16 = vld [vmem:[%s2062_s1 + $0x18] sm:$0xff]  ;;  %v227_v17 = vld [vmem:[%s2062_s1 + $0x20] sm:$0xff]  ;;  %v228_v18 = vld [vmem:[%s2062_s1 + $0x28] sm:$0xff]  ;;  %s1185_s17 = sshll.u32 %s215_s16, 2 }
  0x1a   : > { %s1469_s13 = scalar_lea.vmem %s2061_s0, %s1219_s10  ;;  %v229_v19 = vld [vmem:[%s2062_s1 + $0x30] sm:$0xff]  ;;  %v230_v20 = vld [vmem:[%s2062_s1 + $0x38] sm:$0xff]  ;;  %s217_s25 = scalar_lea.vmem [#allocation2], %s1185_s17 }
  0x1b   : > { %v241_v6 = vld [vmem:[%s1469_s13] sm:$0xff]  ;;  %s1122_s26 = sshll.u32 %s217_s25, 4  ;;  %s2019_s7 = scalar_lea.hbm %s2066_s5, %s1216_s23  ;;  %s2021_s26 = int_to_ptr.vmem [resolvable:$true] %s1122_s26 }
  0x1c   : > { %v1478_v7 = vcombine.high %v241_v6, %v241_v6  ;;  %249 = vperm.xlu0 %1277, %v232_v4   ;;  %259 = vperm.xlu1 %1278, %v234_v5   ;;  %s1313_s8 = scalar_lea.vmem %s2021_s26, 64  ;;  %s1379_s22 = smov [#allocation2]  }
  0x1d   : > { %p1314_p11 = scmp.ne.s32.totalorder %s2021_s26, %s1313_s8  ;;  %s1317_s9 = sshll.u32 %s1379_s22, 4  ;;  %s1318_s9 = int_to_ptr.vmem [resolvable:$false] %s1317_s9 }
  0x1e   : > { %2078 = vst [vmem:[#allocation5_spill] sm:$0xff] %v1478_v7  ;;  %1188 = vmatprep.subr.msk.mxu0 %vm309_vm0, %v1478_v7  ;;  %s1319_s10 = scalar_lea.vmem %s1318_s9, 128  ;;  %p1320_p0 = scmp.lt.s32.totalorder %s2021_s26, %s1318_s9 }
  0x1f   : > { %1189 = vmatpush1.msk.msra.mxu0 %vm309_vm0, %v241_v6  ;;  %p1315_p12 = pnand %p1314_p11, %p1448_p5  ;;  %p1321_p1 = scmp.lt.s32.totalorder %s1319_s10, %s1313_s8 }
  0x20   : > { %1190 = vmatmul.mubr.msk.f32.vlgmr.msra.gmra.mrb[0].mxu0 %vm284_vm1, %v223_v8  ;;  %264 = vperm.xlu0 %1277, %v235_v9  }
  0x21   : > { %384 = vmatprep.mubr.f32.mxu0 %v1377_v0  ;;  %269 = vperm.xlu1 %1278, %v236_v10   ;;  %p1316_p13 = pneg %p1315_p12  ;;  %p1322_p2 = por %p1321_p1, %p1320_p0 }
  0x23   : > { %p1323_p3 = pnand %p1322_p2, %p1316_p13 }
  0x24   : > { %1191 = vmatmul.mubr.msk.f32.gmra.mrb[2].mxu0 %vm284_vm1, %v224_v11  ;;  %274 = vperm.xlu0 %1277, %v237_v12  }
  0x25   : > { %390 = vmatprep.mubr.f32.mxu0 %v1377_v0  ;;  %279 = vperm.xlu1 %1278, %v238_v13  }
  0x28   : > { %1192 = vmatmul.mubr.msk.f32.gmra.mrb[4].mxu0 %vm284_vm1, %v225_v14  ;;  %957 = vperm.xlu0 %1277, %v240_v15  }
  0x29   : > { %396 = vmatprep.mubr.f32.mxu0 %v1377_v0 }
  0x2c   : > { %1193 = vmatmul.mubr.msk.f32.gmra.mrb[6].mxu0 %vm284_vm1, %v226_v16 }
  0x2d   : > { %402 = vmatprep.mubr.f32.mxu0 %v1377_v0 }
  0x30   : > { %1194 = vmatmul.mubr.msk.f32.gmra.mrb[8].mxu0 %vm284_vm1, %v227_v17 }
  0x31   : > { %408 = vmatprep.mubr.f32.mxu0 %v1377_v0 }
  0x34   : > { %1195 = vmatmul.mubr.msk.f32.gmra.mrb[10].mxu0 %vm284_vm1, %v228_v18 }
  0x35   : > { %414 = vmatprep.mubr.f32.mxu0 %v1377_v0 }
  0x38   : > { %1196 = vmatmul.mubr.msk.f32.gmra.mrb[12].mxu0 %vm284_vm1, %v229_v19 }
  0x39   : > { %420 = vmatprep.mubr.f32.mxu0 %v1377_v0 }
  0x3c   : > { %1197 = vmatmul.mubr.msk.f32.gmra.mrb[14].mxu0 %vm284_vm1, %v230_v20 }
  0x97   : > { %v245_v23 = vpop.permute.xlu0 %244  ;;  %v255_v29 = vpop.permute.xlu1 %254 }
  0x9b   : > { %v250_v30 = vpop.permute.xlu0 %249  ;;  %v260_v54 = vpop.permute.xlu1 %259 }
  0xf3   : > { %v380_v21 = vpop.f32.mrb[0].mxu0 }
  0xf4   : > { %v382_v22 = vpop.f32.mrb[1].mxu0  ;;  %v1530_v27 = vadd.f32 %v380_v21, %v245_v23 }
  0xf5   : > { %v1528_v24 = vadd.f32 %v382_v22, %v245_v23 }
  0xf6   : > { %2079 = vst [vmem:[#allocation6_spill] sm:$0xff] %v1530_v27  ;;  %v443_v36 = vmul.f32 0.70710677, %v1530_v27 }
  0xf7   : > { %v386_v25 = vpop.f32.mrb[2].mxu0  ;;  %v444_v28 = vmul.f32 0.70710677, %v1528_v24 }
  0xf8   : > { %v388_v26 = vpop.f32.mrb[3].mxu0  ;;  %v1538_v41 = vadd.f32 %v386_v25, %v250_v30  ;;  %v1545_v46 = vclamps-f32 %v443_v36, 4.0 }
  0xf9   : > { %v1533_v32 = vadd.f32 %v388_v26, %v250_v30  ;;  %v1536_v37 = vclamps-f32 %v444_v28, 4.0 }
  0xfa   : > { %2081 = vst [vmem:[#allocation8_spill] sm:$0xff] %v1538_v41  ;;  %2082 = vst [vmem:[#allocation9_spill] sm:$0xff] %v1545_v46  ;;  %v445_v50 = vmul.f32 0.70710677, %v1538_v41  ;;  %v1568_v57 = vmul.f32 %v1545_v46, %v1545_v46 }
  0xfb   : > { %v392_v31 = vpop.f32.mrb[4].mxu0  ;;  %2080 = vst [vmem:[#allocation7_spill] sm:$0xff] %v1533_v32  ;;  %v446_v42 = vmul.f32 0.70710677, %v1533_v32  ;;  %v1549_v47 = vmul.f32 %v1536_v37, %v1536_v37 }
  0xfc   : > { %v393_v33 = vadd.f32 %v392_v31, %v255_v29  ;;  %v394_v34 = vpop.f32.mrb[5].mxu0  ;;  %v1573_v61 = vclamps-f32 %v445_v50, 4.0  ;;  %v507_v4 = vmul.f32 0.00022905065, %v1568_v57  ;;  %v1589_v10 = vmul.f32 -1.1791603e-07, %v1568_v57 }
  0xfd   : > { %v395_v35 = vadd.f32 %v394_v34, %v255_v29  ;;  %v1560_v51 = vclamps-f32 %v446_v42, 4.0  ;;  %v508_v58 = vmul.f32 0.00022905065, %v1549_v47  ;;  %v1604_v19 = vmul.f32 -1.1791603e-07, %v1549_v47  ;;  %v265_v34 = vpop.permute.xlu0 %264 }
  0xfe   : > { %v447_v38 = vmul.f32 0.70710677, %v393_v33  ;;  %2083 = vst [vmem:[#allocation10_spill] sm:$0xff] %v1573_v61  ;;  %v1593_v11 = vmul.f32 %v1573_v61, %v1573_v61  ;;  %v523_v20 = vadd.f32 0.003408291, %v507_v4  ;;  %v1610_v25 = vmul.f32 0.5, %v393_v33 }
  0xff   : > { %v448_v39 = vmul.f32 0.70710677, %v395_v35  ;;  %v398_v40 = vpop.f32.mrb[6].mxu0  ;;  %v1577_v62 = vmul.f32 %v1560_v51, %v1560_v51  ;;  %v524_v5 = vadd.f32 0.003408291, %v508_v58  ;;  %v1612_v28 = vmul.f32 0.5, %v395_v35 }
 0x100   : > { %v1541_v43 = vclamps-f32 %v447_v38, 4.0  ;;  %v400_v44 = vpop.f32.mrb[7].mxu0  ;;  %v1571_v59 = vadd.f32 %v398_v40, %v260_v54  ;;  %v509_v31 = vmul.f32 0.00022905065, %v1593_v11 }
 0x101   : > { %v1543_v45 = vclamps-f32 %v448_v39, 4.0  ;;  %v510_v12 = vmul.f32 0.00022905065, %v1577_v62  ;;  %v1599_v17 = vadd.f32 %v400_v44, %v260_v54  ;;  %v540_v21 = vmul.f32 %v524_v5, %v1549_v47 }
 0x102   : > { %v1553_v48 = vmul.f32 %v1541_v43, %v1541_v43  ;;  %v449_v6 = vmul.f32 0.70710677, %v1571_v59 }
 0x103   : > { %v1557_v49 = vmul.f32 %v1543_v45, %v1543_v45  ;;  %v404_v53 = vpop.f32.mrb[8].mxu0  ;;  %v526_v36 = vadd.f32 0.003408291, %v510_v12  ;;  %v450_v42 = vmul.f32 0.70710677, %v1599_v17 }
 0x104   : > { %v639_v52 = vmul.f32 -1.1791603e-07, %v1553_v48  ;;  %v1564_v56 = vpop.f32.mrb[9].mxu0  ;;  %v511_v63 = vmul.f32 0.00022905065, %v1553_v48  ;;  %v1608_v23 = vclamps-f32 %v449_v6, 4.0  ;;  %v1627_v44 = vadd.f32 %v404_v53, %v265_v34 }
 0x105   : > { %v640_v55 = vmul.f32 -1.1791603e-07, %v1557_v49  ;;  %v512_v22 = vmul.f32 0.00022905065, %v1557_v49  ;;  %v556_v50 = vadd.f32 0.050955694, %v540_v21 }
 0x106   : > { %v655_v60 = vadd.f32 2.3547966e-05, %v639_v52  ;;  %v527_v13 = vadd.f32 0.003408291, %v511_v63  ;;  %v1621_v39 = vmul.f32 %v1608_v23, %v1608_v23  ;;  %v1634_v63 = vclamps-f32 %v450_v42, 4.0 }
 0x107   : > { %v1580_v0 = vpop.f32.mrb[10].mxu0  ;;  %v656_v2 = vadd.f32 2.3547966e-05, %v640_v55  ;;  %v528_v52 = vadd.f32 0.003408291, %v512_v22  ;;  %v1631_v55 = vmul.f32 %v523_v20, %v1568_v57  ;;  %v572_v12 = vmul.f32 %v556_v50, %v1549_v47 }
 0x108   : > { %v671_v1 = vmul.f32 %v655_v60, %v1553_v48  ;;  %v1583_v3 = vpop.f32.mrb[11].mxu0  ;;  %v543_v38 = vmul.f32 %v527_v13, %v1553_v48  ;;  %v641_v54 = vmul.f32 -1.1791603e-07, %v1621_v39  ;;  %v513_v22 = vmul.f32 0.00022905065, %v1621_v39 }
 0x109   : > { %v672_v9 = vmul.f32 %v656_v2, %v1557_v49  ;;  %v542_v2 = vmul.f32 %v526_v36, %v1577_v62  ;;  %v544_v13 = vmul.f32 %v528_v52, %v1557_v49  ;;  %v588_v42 = vadd.f32 0.18520832, %v572_v12 }
 0x10a   : > { %v687_v8 = vadd.f32 0.0010179626, %v671_v1  ;;  %v525_v1 = vadd.f32 0.003408291, %v509_v31  ;;  %v559_v4 = vadd.f32 0.050955694, %v543_v38 }
 0x10b   : > { %v1596_v14 = vpop.f32.mrb[12].mxu0  ;;  %v688_v16 = vadd.f32 0.0010179626, %v672_v9  ;;  %v657_v5 = vadd.f32 2.3547966e-05, %v641_v54 }
 0x10c   : > { %v703_v15 = vmul.f32 %v687_v8, %v1553_v48  ;;  %v1601_v18 = vpop.f32.mrb[13].mxu0  ;;  %v1640_v8 = vmul.f32 %v1634_v63, %v1634_v63  ;;  %v451_v9 = vmul.f32 0.70710677, %v1627_v44  ;;  %v560_v50 = vadd.f32 0.050955694, %v544_v13 }
 0x10d   : > { %v704_v29 = vmul.f32 %v688_v16, %v1557_v49  ;;  %v1647_v16 = vadd.f32 %v1564_v56, %v265_v34 }
 0x10e   : > { %v719_v26 = vadd.f32 0.01407047, %v703_v15  ;;  %v673_v15 = vmul.f32 %v657_v5, %v1621_v39  ;;  %v514_v36 = vmul.f32 0.00022905065, %v1640_v8  ;;  %v1656_v38 = vclamps-f32 %v451_v9, 4.0 }
 0x10f   : > { %v1615_v30 = vpop.f32.mrb[14].mxu0  ;;  %v720_v35 = vadd.f32 0.01407047, %v704_v29  ;;  %v1653_v29 = vmul.f32 0.5, %v1571_v59  ;;  %v452_v5 = vmul.f32 0.70710677, %v1647_v16 }
 0x110   : > { %v1623_v40 = vpop.f32.mrb[15].mxu0  ;;  %v735_v33 = vmul.f32 %v719_v26, %v1553_v48  ;;  %v642_v26 = vmul.f32 -1.1791603e-07, %v1640_v8  ;;  %v689_v31 = vadd.f32 0.0010179626, %v673_v15  ;;  %v1663_v54 = vmul.f32 %v1656_v38, %v1656_v38 }
 0x111   : > { %v736_v60 = vmul.f32 %v720_v35, %v1557_v49  ;;  %v575_v35 = vmul.f32 %v559_v4, %v1553_v48 }
 0x112   : > { %v751_v58 = vadd.f32 0.11098505, %v735_v33  ;;  %v558_v33 = vadd.f32 0.050955694, %v542_v2  ;;  %v658_v34 = vadd.f32 2.3547966e-05, %v642_v26  ;;  %v705_v52 = vmul.f32 %v689_v31, %v1621_v39 }
 0x113   : > { %v752_v6 = vadd.f32 0.11098505, %v736_v60  ;;  %v1668_v2 = vmul.f32 %v525_v1, %v1593_v11  ;;  %v591_v12 = vadd.f32 0.18520832, %v575_v35  ;;  %v643_v26 = vmul.f32 -1.1791603e-07, %v1663_v54 }
 0x114   : > { %v767_v53 = vmul.f32 %v751_v58, %v1553_v48  ;;  %v529_v58 = vadd.f32 0.003408291, %v513_v22  ;;  %v674_v60 = vmul.f32 %v658_v34, %v1640_v8  ;;  %v721_v4 = vadd.f32 0.01407047, %v705_v52 }
 0x115   : > { %v768_v21 = vmul.f32 %v752_v6, %v1557_v49  ;;  %v515_v6 = vmul.f32 0.00022905065, %v1663_v54  ;;  %v574_v9 = vmul.f32 %v558_v33, %v1577_v62  ;;  %v1682_v33 = vclamps-f32 %v452_v5, 4.0 }
 0x116   : > { %v783_v20 = vadd.f32 0.49746925, %v767_v53  ;;  %v530_v53 = vadd.f32 0.003408291, %v514_v36  ;;  %v690_v15 = vadd.f32 0.0010179626, %v674_v60  ;;  %v545_v31 = vmul.f32 %v529_v58, %v1621_v39  ;;  %v1679_v36 = vpop.permute.xlu1 %269 }
 0x117   : > { %v784_v59 = vadd.f32 0.49746925, %v768_v21  ;;  %v737_v21 = vmul.f32 %v721_v4, %v1621_v39  ;;  %v531_v22 = vadd.f32 0.003408291, %v515_v6  ;;  %v659_v52 = vadd.f32 2.3547966e-05, %v643_v26 }
 0x118   : > { %v799_v56 = vmul.f32 %v783_v20, %v1553_v48  ;;  %v576_v20 = vmul.f32 %v560_v50, %v1557_v49  ;;  %v706_v34 = vmul.f32 %v690_v15, %v1640_v8  ;;  %v1687_v50 = vadd.f32 %v1580_v0, %v1679_v36 }
 0x119   : > { %v800_v1 = vmul.f32 %v784_v59, %v1557_v49  ;;  %v753_v35 = vadd.f32 0.11098505, %v737_v21  ;;  %v590_v60 = vadd.f32 0.18520832, %v574_v9  ;;  %v1692_v58 = vmul.f32 %v1682_v33, %v1682_v33 }
 0x11a   : > { %v1672_v13 = vadd.f32 1.0, %v799_v56  ;;  %v546_v56 = vmul.f32 %v530_v53, %v1640_v8  ;;  %v722_v59 = vadd.f32 0.01407047, %v706_v34  ;;  %v592_v4 = vadd.f32 0.18520832, %v576_v20 }
 0x11b   : > { %v769_v5 = vmul.f32 %v753_v35, %v1621_v39  ;;  %v547_v6 = vmul.f32 %v531_v22, %v1663_v54  ;;  %v675_v53 = vmul.f32 %v659_v52, %v1663_v54  ;;  %v1697_v15 = vadd.f32 1.0, %v800_v1 }
 0x11c   : > { %1280 = vrcp.f32 %v1672_v13  ;;  %v561_v21 = vadd.f32 0.050955694, %v545_v31  ;;  %v738_v0 = vmul.f32 %v722_v59, %v1640_v8  ;;  %v644_v9 = vmul.f32 -1.1791603e-07, %v1692_v58 }
 0x11d   : > { %v607_v26 = vmul.f32 %v591_v12, %v1553_v48  ;;  %v562_v34 = vadd.f32 0.050955694, %v546_v56  ;;  %v691_v7 = vadd.f32 0.0010179626, %v675_v53  ;;  %v453_v41 = vmul.f32 0.70710677, %v1687_v50 }
 0x11e   : > { %v1704_v20 = vmul.f32 %v588_v42, %v1549_v47  ;;  %v785_v35 = vadd.f32 0.49746925, %v769_v5  ;;  %v754_v22 = vadd.f32 0.11098505, %v738_v0  ;;  %v516_v52 = vmul.f32 0.00022905065, %v1692_v58 }
 0x11f   : > { %v1708_v1 = vmul.f32 %v590_v60, %v1577_v62  ;;  %v563_v31 = vadd.f32 0.050955694, %v547_v6  ;;  %v707_v59 = vmul.f32 %v691_v7, %v1663_v54  ;;  %v660_v27 = vadd.f32 2.3547966e-05, %v644_v9 }
 0x120   : > { %v608_v48 = vmul.f32 %v592_v4, %v1557_v49  ;;  %1282 = vrcp.f32 %v1697_v15  ;;  %v770_v12 = vmul.f32 %v754_v22, %v1640_v8  ;;  %v1714_v56 = vclamps-f32 %v453_v41, 4.0 }
 0x121   : > { %v623_v42 = vadd.f32 1.1283791, %v607_v26  ;;  %v577_v5 = vmul.f32 %v561_v21, %v1621_v39  ;;  %v578_v53 = vmul.f32 %v562_v34, %v1640_v8  ;;  %v723_v0 = vadd.f32 0.01407047, %v707_v59 }
 0x122   : > { %v801_v60 = vmul.f32 %v785_v35, %v1621_v39  ;;  %v786_v6 = vadd.f32 0.49746925, %v770_v12  ;;  %v532_v61 = vadd.f32 0.003408291, %v516_v52  ;;  %v676_v7 = vmul.f32 %v660_v27, %v1692_v58 }
 0x123   : > { %v1721_v49 = vmul.f32 0.5, %v1599_v17  ;;  %v1724_v4 = vmul.f32 0.5, %v1627_v44  ;;  %v579_v41 = vmul.f32 %v563_v31, %v1663_v54  ;;  %v1729_v21 = vmul.f32 %v1714_v56, %v1714_v56 }
 0x124   : > { %v624_v26 = vadd.f32 1.1283791, %v608_v48  ;;  %v802_v34 = vmul.f32 %v786_v6, %v1640_v8  ;;  %v739_v35 = vmul.f32 %v723_v0, %v1663_v54  ;;  %v692_v22 = vadd.f32 0.0010179626, %v676_v7 }
 0x125   : > { %v895_v27 = vmul.f32 %v1541_v43, %v623_v42  ;;  %v593_v17 = vadd.f32 0.18520832, %v577_v5  ;;  %v594_v52 = vadd.f32 0.18520832, %v578_v53  ;;  %v1735_v44 = vmul.f32 0.5, %v1647_v16  ;;  %v275_v43 = vpop.permute.xlu0 %274 }
 0x126   : > { %v1281_v9 = vpop.eup %1280  ;;  %v1737_v59 = vadd.f32 1.0, %v801_v60  ;;  %v755_v31 = vadd.f32 0.11098505, %v739_v35  ;;  %v548_v12 = vmul.f32 %v532_v61, %v1692_v58  ;;  %v708_v46 = vmul.f32 %v692_v22, %v1692_v58 }
 0x127   : > { %v847_v48 = vmul.f32 %v1281_v9, %v1672_v13  ;;  %v595_v6 = vadd.f32 0.18520832, %v579_v41  ;;  %v517_v0 = vmul.f32 0.00022905065, %v1729_v21  ;;  %v645_v7 = vmul.f32 -1.1791603e-07, %v1729_v21 }
 0x128   : > { %v1744_v42 = vadd.f32 1.0, %v802_v34  ;;  %v771_v16 = vmul.f32 %v755_v31, %v1663_v54  ;;  %v724_v5 = vadd.f32 0.01407047, %v708_v46  ;;  %v1749_v53 = vadd.f32 %v1583_v3, %v1679_v36 }
 0x129   : > { %v609_v61 = vmul.f32 %v593_v17, %v1621_v39  ;;  %v610_v60 = vmul.f32 %v594_v52, %v1640_v8  ;;  %v661_v13 = vadd.f32 2.3547966e-05, %v645_v7  ;;  %v1754_v41 = vadd.f32 %v1596_v14, %v275_v43 }
 0x12a   : > { %v1283_v35 = vpop.eup %1282  ;;  %1284 = vrcp.f32 %v1737_v59  ;;  %v787_v34 = vadd.f32 0.49746925, %v771_v16  ;;  %v564_v22 = vadd.f32 0.050955694, %v548_v12  ;;  %v740_v31 = vmul.f32 %v724_v5, %v1692_v58 }
 0x12b   : > { %2084 = vst [vmem:[#allocation11_spill] sm:$0xff] %v1754_v41  ;;  %v863_v46 = vsub.f32 2.0, %v847_v48  ;;  %v611_v32 = vmul.f32 %v595_v6, %v1663_v54  ;;  %v533_v3 = vadd.f32 0.003408291, %v517_v0  ;;  %v677_v36 = vmul.f32 %v661_v13, %v1729_v21 }
 0x12c   : > { %1286 = vrcp.f32 %v1744_v42  ;;  %v803_v39 = vmul.f32 %v787_v34, %v1663_v54  ;;  %v756_v8 = vadd.f32 0.11098505, %v740_v31  ;;  %v454_v14 = vmul.f32 0.70710677, %v1749_v53 }
 0x12d   : > { %v848_v17 = vmul.f32 %v1283_v35, %v1697_v15  ;;  %v625_v52 = vadd.f32 1.1283791, %v609_v61  ;;  %v1765_v12 = vmul.f32 0.5, %v1687_v50  ;;  %v693_v7 = vadd.f32 0.0010179626, %v677_v36 }
 0x12e   : > { %v819_v48 = vadd.f32 1.0, %v803_v39  ;;  %v580_v6 = vmul.f32 %v564_v22, %v1692_v58  ;;  %v772_v0 = vmul.f32 %v756_v8, %v1692_v58  ;;  %v1769_v16 = vclamps-f32 %v454_v14, 4.0 }
 0x12f   : > { %v879_v5 = vmul.f32 %v1281_v9, %v863_v46  ;;  %v626_v13 = vadd.f32 1.1283791, %v610_v60  ;;  %v709_v54 = vmul.f32 %v693_v7, %v1729_v21  ;;  %v455_v34 = vmul.f32 0.70710677, %v1754_v41 }
 0x130   : > { %v627_v31 = vadd.f32 1.1283791, %v611_v32  ;;  %1288 = vrcp.f32 %v819_v48  ;;  %v549_v15 = vmul.f32 %v533_v3, %v1729_v21  ;;  %v1776_v50 = vmul.f32 %v1769_v16, %v1769_v16 }
 0x131   : > { %v864_v61 = vsub.f32 2.0, %v848_v17  ;;  %v788_v22 = vadd.f32 0.49746925, %v772_v0  ;;  %v725_v36 = vadd.f32 0.01407047, %v709_v54  ;;  %v1778_v39 = vclamps-f32 %v455_v34, 4.0 }
 0x132   : > { %v896_v9 = vmul.f32 %v1543_v45, %v624_v26  ;;  %v596_v60 = vadd.f32 0.18520832, %v580_v6  ;;  %v518_v46 = vmul.f32 0.00022905065, %v1776_v50  ;;  %v646_v8 = vmul.f32 -1.1791603e-07, %v1776_v50 }
 0x133   : > { %2085 = vst [vmem:[#allocation12_spill] sm:$0xff] %v1778_v39  ;;  %v911_v32 = vmul.f32 %v895_v27, %v879_v5  ;;  %v1784_v14 = vmul.f32 %v1608_v23, %v625_v52  ;;  %v741_v3 = vmul.f32 %v725_v36, %v1729_v21  ;;  %v1789_v17 = vmul.f32 %v1778_v39, %v1778_v39 }
 0x134   : > { %v1285_v7 = vpop.eup %1284  ;;  %v565_v0 = vadd.f32 0.050955694, %v549_v15  ;;  %v534_v54 = vadd.f32 0.003408291, %v518_v46  ;;  %v662_v34 = vadd.f32 2.3547966e-05, %v646_v8  ;;  %v1792_v45 = vadd.f32 %v1601_v18, %v275_v43 }
 0x135   : > { %v1795_v26 = vmul.f32 %v1634_v63, %v626_v13  ;;  %v1798_v27 = vmul.f32 %v1656_v38, %v627_v31  ;;  %v804_v23 = vmul.f32 %v788_v22, %v1692_v58  ;;  %v757_v52 = vadd.f32 0.11098505, %v741_v3 }
 0x136   : > { %2086 = vst [vmem:[#allocation13_spill] sm:$0xff] %v1792_v45  ;;  %v1287_v6 = vpop.eup %1286  ;;  %v880_v5 = vmul.f32 %v1283_v35, %v864_v61  ;;  %v612_v36 = vmul.f32 %v596_v60, %v1692_v58  ;;  %v678_v15 = vmul.f32 %v662_v34, %v1776_v50  ;;  %v519_v46 = vmul.f32 0.00022905065, %v1789_v17 }
 0x137   : > { %v849_v18 = vmul.f32 %v1285_v7, %v1737_v59  ;;  %v773_v43 = vmul.f32 %v757_v52, %v1729_v21  ;;  %v550_v63 = vmul.f32 %v534_v54, %v1776_v50  ;;  %v647_v38 = vmul.f32 -1.1791603e-07, %v1789_v17 }
 0x138   : > { %v927_v13 = vadd.f32 1.0, %v911_v32  ;;  %v581_v31 = vmul.f32 %v565_v0, %v1729_v21  ;;  %v694_v22 = vadd.f32 0.0010179626, %v678_v15  ;;  %v456_v35 = vmul.f32 0.70710677, %v1792_v45 }
 0x139   : > { %v850_v58 = vmul.f32 %v1287_v6, %v1744_v42  ;;  %v1811_v61 = vadd.f32 1.0, %v804_v23  ;;  %v789_v60 = vadd.f32 0.49746925, %v773_v43  ;;  %v663_v8 = vadd.f32 2.3547966e-05, %v647_v38 }
 0x13a   : > { %v1289_v3 = vpop.eup %1288  ;;  %v912_v59 = vmul.f32 %v896_v9, %v880_v5  ;;  %v710_v34 = vmul.f32 %v694_v22, %v1776_v50  ;;  %v535_v52 = vadd.f32 0.003408291, %v519_v46  ;;  %v1814_v54 = vclamps-f32 %v456_v35, 4.0 }
 0x13b   : > { %v865_v41 = vsub.f32 2.0, %v849_v18  ;;  %v628_v32 = vadd.f32 1.1283791, %v612_v36  ;;  %v805_v0 = vmul.f32 %v789_v60, %v1729_v21  ;;  %v566_v15 = vadd.f32 0.050955694, %v550_v63 }
 0x13c   : > { %v851_v39 = vmul.f32 %v1289_v3, %v819_v48  ;;  %v726_v45 = vadd.f32 0.01407047, %v710_v34  ;;  %v679_v42 = vmul.f32 %v663_v8, %v1789_v17  ;;  %v1820_v23 = vmul.f32 %v1814_v54, %v1814_v54  ;;  %v280_v34 = vpop.permute.xlu1 %279 }
 0x13d   : > { %v866_v43 = vsub.f32 2.0, %v850_v58  ;;  %1290 = vrcp.f32 %v1811_v61  ;;  %v597_v9 = vadd.f32 0.18520832, %v581_v31  ;;  %v1823_v5 = vadd.f32 1.0, %v805_v0 }
 0x13e   : > { %v1826_v46 = vmul.f32 0.5, %v1749_v53  ;;  %v742_v36 = vmul.f32 %v726_v45, %v1776_v50  ;;  %v551_v48 = vmul.f32 %v535_v52, %v1789_v17  ;;  %v695_v18 = vadd.f32 0.0010179626, %v679_v42 }
 0x13f   : > { %v1831_v63 = vmul.f32 %v927_v13, %v1610_v25  ;;  %v928_v38 = vadd.f32 1.0, %v912_v59  ;;  %v881_v22 = vmul.f32 %v1285_v7, %v865_v41  ;;  %v648_v35 = vmul.f32 -1.1791603e-07, %v1820_v23 }
 0x140   : > { %v867_v58 = vsub.f32 2.0, %v851_v39  ;;  %v582_v31 = vmul.f32 %v566_v15, %v1776_v50  ;;  %v758_v60 = vadd.f32 0.11098505, %v742_v36  ;;  %v711_v8 = vmul.f32 %v695_v18, %v1789_v17 }
 0x141   : > { %v882_v53 = vmul.f32 %v1287_v6, %v866_v43  ;;  %v613_v45 = vmul.f32 %v597_v9, %v1729_v21  ;;  %1292 = vrcp.f32 %v1823_v5  ;;  %v664_v52 = vadd.f32 2.3547966e-05, %v648_v35 }
 0x142   : > { %v774_v25 = vmul.f32 %v758_v60, %v1776_v50  ;;  %v567_v13 = vadd.f32 0.050955694, %v551_v48  ;;  %v727_v59 = vadd.f32 0.01407047, %v711_v8  ;;  %v1840_v41 = vadd.f32 %v1615_v30, %v280_v34 }
 0x143   : > { %v913_v39 = vmul.f32 %v1784_v14, %v881_v22  ;;  %v1844_v7 = vmul.f32 %v1682_v33, %v628_v32  ;;  %v520_v6 = vmul.f32 0.00022905065, %v1820_v23  ;;  %v680_v0 = vmul.f32 %v664_v52, %v1820_v23 }
 0x144   : > { %v883_v21 = vmul.f32 %v1289_v3, %v867_v58  ;;  %v598_v15 = vadd.f32 0.18520832, %v582_v31  ;;  %v790_v42 = vadd.f32 0.49746925, %v774_v25  ;;  %v743_v43 = vmul.f32 %v727_v59, %v1789_v17 }
 0x145   : > { %v1850_v9 = vmul.f32 %v928_v38, %v1612_v28  ;;  %v914_v30 = vmul.f32 %v1795_v26, %v882_v53  ;;  %v629_v36 = vadd.f32 1.1283791, %v613_v45  ;;  %v696_v48 = vadd.f32 0.0010179626, %v680_v0 }
 0x146   : > { %v806_v14 = vmul.f32 %v790_v42, %v1776_v50  ;;  %v583_v33 = vmul.f32 %v567_v13, %v1789_v17  ;;  %v759_v32 = vadd.f32 0.11098505, %v743_v43  ;;  %v457_v18 = vmul.f32 0.70710677, %v1840_v41 }
 0x147   : > { %v1291_v22 = vpop.eup %1290  ;;  %v929_v3 = vadd.f32 1.0, %v913_v39  ;;  %v536_v35 = vadd.f32 0.003408291, %v520_v6  ;;  %v712_v58 = vmul.f32 %v696_v48, %v1820_v23  ;;  %v1858_v31 = vadd.f32 %v1623_v40, %v280_v34 }
 0x148   : > { %v915_v28 = vmul.f32 %v1798_v27, %v883_v21  ;;  %v614_v26 = vmul.f32 %v598_v15, %v1776_v50  ;;  %v822_v38 = vadd.f32 1.0, %v806_v14  ;;  %v1862_v60 = vclamps-f32 %v457_v18, 4.0 }
 0x149   : > { %v930_v8 = vadd.f32 1.0, %v914_v30  ;;  %v775_v53 = vmul.f32 %v759_v32, %v1789_v17  ;;  %v728_v45 = vadd.f32 0.01407047, %v712_v58  ;;  %v458_v52 = vmul.f32 0.70710677, %v1858_v31 }
 0x14a   : > { %v852_v25 = vmul.f32 %v1291_v22, %v1811_v61  ;;  %1294 = vrcp.f32 %v822_v38  ;;  %v599_v13 = vadd.f32 0.18520832, %v583_v33  ;;  %v638_v40 = vmul.f32 -1.1791603e-07, %v1577_v62 }
 0x14b   : > { %v1293_v34 = vpop.eup %1292  ;;  %v552_v27 = vmul.f32 %v536_v35, %v1820_v23  ;;  %v744_v50 = vmul.f32 %v728_v45, %v1820_v23  ;;  %v1872_v59 = vmul.f32 %v1862_v60, %v1862_v60  ;;  %v1874_v39 = vclamps-f32 %v458_v52, 4.0 }
 0x14c   : > { %v931_v6 = vadd.f32 1.0, %v915_v28  ;;  %v901_v0 = vmul.f32 %v1714_v56, %v629_v36  ;;  %v630_v21 = vadd.f32 1.1283791, %v614_v26  ;;  %v652_v61 = vadd.f32 2.3547966e-05, %v1604_v19 }
 0x14d   : > { %v791_v15 = vadd.f32 0.49746925, %v775_v53  ;;  %v760_v42 = vadd.f32 0.11098505, %v744_v50  ;;  %v649_v43 = vmul.f32 -1.1791603e-07, %v1872_v59  ;;  %v1881_v30 = vmul.f32 %v1874_v39, %v1874_v39 }
 0x14e   : > { %v1884_v48 = vmul.f32 %v929_v3, %v1653_v29  ;;  %v1887_v14 = vmul.f32 %v930_v8, %v1721_v49  ;;  %v853_v33 = vmul.f32 %v1293_v34, %v1823_v5  ;;  %v654_v56 = vadd.f32 2.3547966e-05, %v638_v40 }
 0x14f   : > { %v868_v36 = vsub.f32 2.0, %v852_v25  ;;  %v568_v32 = vadd.f32 0.050955694, %v552_v27  ;;  %v776_v19 = vmul.f32 %v760_v42, %v1820_v23  ;;  %v665_v18 = vadd.f32 2.3547966e-05, %v649_v43 }
 0x150   : > { %v902_v35 = vmul.f32 %v1769_v16, %v630_v21  ;;  %v1893_v58 = vmul.f32 %v599_v13, %v1789_v17  ;;  %v650_v28 = vmul.f32 -1.1791603e-07, %v1881_v30  ;;  %v668_v29 = vmul.f32 %v652_v61, %v1549_v47 }
 0x151   : > { %v1898_v49 = vmul.f32 %v931_v6, %v1724_v4  ;;  %v807_v5 = vmul.f32 %v791_v15, %v1789_v17  ;;  %v792_v3 = vadd.f32 0.49746925, %v776_v19  ;;  %v681_v26 = vmul.f32 %v665_v18, %v1872_v59 }
 0x152   : > { %v869_v8 = vsub.f32 2.0, %v853_v33  ;;  %v666_v53 = vadd.f32 2.3547966e-05, %v650_v28  ;;  %v670_v45 = vmul.f32 %v654_v56, %v1577_v62  ;;  %v684_v16 = vadd.f32 0.0010179626, %v668_v29 }
 0x153   : > { %v884_v52 = vmul.f32 %v1291_v22, %v868_v36  ;;  %v584_v25 = vmul.f32 %v568_v32, %v1820_v23  ;;  %v808_v13 = vmul.f32 %v792_v3, %v1820_v23  ;;  %v697_v40 = vadd.f32 0.0010179626, %v681_v26 }
 0x154   : > { %v1295_v27 = vpop.eup %1294  ;;  %v521_v4 = vmul.f32 0.00022905065, %v1872_v59  ;;  %v682_v50 = vmul.f32 %v666_v53, %v1881_v30  ;;  %v686_v17 = vadd.f32 0.0010179626, %v670_v45  ;;  %v700_v6 = vmul.f32 %v684_v16, %v1549_v47 }
 0x155   : > { %v854_v21 = vmul.f32 %v1295_v27, %v822_v38  ;;  %v1908_v61 = vadd.f32 1.0, %v807_v5  ;;  %v713_v15 = vmul.f32 %v697_v40, %v1872_v59  ;;  %v522_v22 = vmul.f32 0.00022905065, %v1881_v30 }
 0x156   : > { %v885_v42 = vmul.f32 %v1293_v34, %v869_v8  ;;  %v698_v43 = vadd.f32 0.0010179626, %v682_v50  ;;  %v702_v33 = vmul.f32 %v686_v17, %v1577_v62  ;;  %v716_v56 = vadd.f32 0.01407047, %v700_v6 }
 0x157   : > { %v916_v36 = vmul.f32 %v1844_v7, %v884_v52  ;;  %v870_v32 = vsub.f32 2.0, %v854_v21  ;;  %v1914_v19 = vadd.f32 1.0, %v808_v13  ;;  %v729_v18 = vadd.f32 0.01407047, %v713_v15 }
 0x158   : > { %v537_v28 = vadd.f32 0.003408291, %v521_v4  ;;  %v714_v38 = vmul.f32 %v698_v43, %v1881_v30  ;;  %v718_v29 = vadd.f32 0.01407047, %v702_v33  ;;  %v732_v5 = vmul.f32 %v716_v56, %v1549_v47 }
 0x159   : > { %v886_v3 = vmul.f32 %v1295_v27, %v870_v32  ;;  %1296 = vrcp.f32 %v1908_v61  ;;  %v745_v34 = vmul.f32 %v729_v18, %v1872_v59  ;;  %v538_v26 = vadd.f32 0.003408291, %v522_v22 }
 0x15a   : > { %v917_v8 = vmul.f32 %v901_v0, %v885_v42  ;;  %v730_v53 = vadd.f32 0.01407047, %v714_v38  ;;  %v734_v7 = vmul.f32 %v718_v29, %v1577_v62  ;;  %v748_v45 = vadd.f32 0.11098505, %v732_v5 }
 0x15b   : > { %v932_v16 = vadd.f32 1.0, %v916_v36  ;;  %v918_v52 = vmul.f32 %v902_v35, %v886_v3  ;;  %1298 = vrcp.f32 %v1914_v19  ;;  %v761_v13 = vadd.f32 0.11098505, %v745_v34 }
 0x15c   : > { %v553_v40 = vmul.f32 %v537_v28, %v1872_v59  ;;  %v746_v4 = vmul.f32 %v730_v53, %v1881_v30  ;;  %v750_v27 = vadd.f32 0.11098505, %v734_v7  ;;  %v764_v50 = vmul.f32 %v748_v45, %v1549_v47 }
 0x15d   : > { %v600_v17 = vadd.f32 0.18520832, %v584_v25  ;;  %v777_v6 = vmul.f32 %v761_v13, %v1872_v59  ;;  %v554_v0 = vmul.f32 %v538_v26, %v1881_v30  ;;  %v637_v21 = vmul.f32 -1.1791603e-07, %v1593_v11 }
 0x15e   : > { %v933_v15 = vadd.f32 1.0, %v917_v8  ;;  %v762_v22 = vadd.f32 0.11098505, %v746_v4  ;;  %v766_v35 = vmul.f32 %v750_v27, %v1577_v62  ;;  %v780_v42 = vadd.f32 0.49746925, %v764_v50 }
 0x15f   : > { %v1930_v43 = vmul.f32 %v932_v16, %v1735_v44  ;;  %v934_v33 = vadd.f32 1.0, %v918_v52  ;;  %v793_v56 = vadd.f32 0.49746925, %v777_v6  ;;  %v651_v36 = vadd.f32 2.3547966e-05, %v1589_v10 }
 0x160   : > { %v569_v32 = vadd.f32 0.050955694, %v553_v40  ;;  %v778_v25 = vmul.f32 %v762_v22, %v1881_v30  ;;  %v782_v18 = vadd.f32 0.49746925, %v766_v35  ;;  %v796_v28 = vmul.f32 %v780_v42, %v1549_v47 }
 0x161   : > { %v809_v38 = vmul.f32 %v793_v56, %v1872_v59  ;;  %v570_v29 = vadd.f32 0.050955694, %v554_v0  ;;  %v653_v5 = vadd.f32 2.3547966e-05, %v637_v21  ;;  %v667_v3 = vmul.f32 %v651_v36, %v1568_v57 }
 0x162   : > { %v1938_v34 = vmul.f32 %v933_v15, %v1765_v12  ;;  %v794_v44 = vadd.f32 0.49746925, %v778_v25  ;;  %v798_v26 = vmul.f32 %v782_v18, %v1577_v62  ;;  %v812_v8 = vadd.f32 1.0, %v796_v28 }
 0x163   : > { %v1297_v10 = vpop.eup %1296  ;;  %v1942_v53 = vmul.f32 %v934_v33, %v1826_v46  ;;  %v825_v7 = vadd.f32 1.0, %v809_v38  ;;  %v669_v47 = vmul.f32 %v653_v5, %v1593_v11  ;;  %v683_v45 = vadd.f32 0.0010179626, %v667_v3 }
 0x164   : > { %v585_v16 = vmul.f32 %v569_v32, %v1872_v59  ;;  %v810_v52 = vmul.f32 %v794_v44, %v1881_v30  ;;  %v814_v13 = vadd.f32 1.0, %v798_v26  ;;  %1300 = vrcp.f32 %v812_v8 }
 0x165   : > { %v1299_v12 = vpop.eup %1298  ;;  %1302 = vrcp.f32 %v825_v7  ;;  %v586_v40 = vmul.f32 %v570_v29, %v1881_v30  ;;  %v685_v62 = vadd.f32 0.0010179626, %v669_v47  ;;  %v699_v4 = vmul.f32 %v683_v45, %v1568_v57 }
 0x166   : > { %v855_v46 = vmul.f32 %v1297_v10, %v1908_v61  ;;  %v826_v27 = vadd.f32 1.0, %v810_v52  ;;  %1304 = vrcp.f32 %v814_v13  ;;  %v1224_v50 = vpack.c.bf16 %v1887_v14, %v1850_v9  ;;  %v239_v9 = vld [vmem:[%s2064_s3] sm:$0xff]  ;;  %v958_v14 = vpop.permute.xlu0 %957 }
 0x167   : > { %v701_v6 = vmul.f32 %v685_v62, %v1593_v11  ;;  %v715_v0 = vadd.f32 0.01407047, %v699_v4  ;;  %v1226_v21 = vpack.c.bf16 %v1884_v48, %v1831_v63  ;;  %v1228_v15 = vpack.c.bf16 %v1942_v53, %v1930_v43  ;;  %v2087_v4 = vld [vmem:[#allocation12_spill] sm:$0xff]  ;;  %v2095_v63 = vld [vmem:[#allocation5_spill] sm:$0xff] }
 0x168   : > { %v856_v22 = vmul.f32 %v1299_v12, %v1914_v19  ;;  %v601_v35 = vadd.f32 0.18520832, %v585_v16  ;;  %1306 = vrcp.f32 %v826_v27  ;;  %v1230_v61 = vpack.c.bf16 %v1938_v34, %v1898_v49  ;;  %v1312_v49 = vld [vmem:[%s1469_s13] sm:$0xff]  ;;  %s1109_s13 = scalar_lea.sflag [#allocation3], %s215_s16 }
 0x169   : > { %v555_v42 = vadd.f32 0.050955694, %v1631_v55  ;;  %v557_v33 = vadd.f32 0.050955694, %v1668_v2  ;;  %v717_v56 = vadd.f32 0.01407047, %v701_v6  ;;  %v731_v36 = vmul.f32 %v715_v0, %v1568_v57 }
 0x16a   : > { %v620_v32 = vadd.f32 1.1283791, %v1704_v20  ;;  %v871_v25 = vsub.f32 2.0, %v855_v46  ;;  %v616_v18 = vmul.f32 %v600_v17, %v1820_v23  ;;  %v602_v28 = vadd.f32 0.18520832, %v586_v40 }
 0x16b   : > { %v622_v19 = vadd.f32 1.1283791, %v1708_v1  ;;  %v733_v38 = vmul.f32 %v717_v56, %v1593_v11  ;;  %v747_v29 = vadd.f32 0.11098505, %v731_v36  ;;  %v1968_v5 = vmul.f32 0.5, %v1528_v24 }
 0x16c   : > { %v631_v55 = vadd.f32 1.1283791, %v1893_v58  ;;  %v872_v2 = vsub.f32 2.0, %v856_v22  ;;  %v617_v3 = vmul.f32 %v601_v35, %v1872_v59  ;;  %v571_v44 = vmul.f32 %v555_v42, %v1568_v57 }
 0x16d   : > { %v573_v20 = vmul.f32 %v557_v33, %v1593_v11  ;;  %v749_v26 = vadd.f32 0.11098505, %v733_v38  ;;  %v763_v23 = vmul.f32 %v747_v29, %v1568_v57  ;;  %v892_v1 = vmul.f32 %v1536_v37, %v620_v32 }
 0x16e   : > { %v1301_v17 = vpop.eup %1300  ;;  %v887_v47 = vmul.f32 %v1297_v10, %v871_v25  ;;  %v632_v45 = vadd.f32 1.1283791, %v616_v18  ;;  %v618_v24 = vmul.f32 %v602_v28, %v1881_v30  ;;  %v894_v58 = vmul.f32 %v1560_v51, %v622_v19 }
 0x16f   : > { %v1303_v16 = vpop.eup %1302  ;;  %v844_v52 = vmul.f32 %v1301_v17, %v812_v8  ;;  %v765_v59 = vmul.f32 %v749_v26, %v1593_v11  ;;  %v779_v40 = vadd.f32 0.49746925, %v763_v23  ;;  %v903_v46 = vmul.f32 %v2087_v4, %v631_v55 }
 0x170   : > { %v1305_v62 = vpop.eup %1304  ;;  %v888_v6 = vmul.f32 %v1299_v12, %v872_v2  ;;  %v633_v0 = vadd.f32 1.1283791, %v617_v3  ;;  %v857_v22 = vmul.f32 %v1303_v16, %v825_v7  ;;  %v904_v56 = vmul.f32 %v1814_v54, %v632_v45  ;;  %v2089_v45 = vld [vmem:[#allocation11_spill] sm:$0xff] }
 0x171   : > { %v846_v35 = vmul.f32 %v1305_v62, %v814_v13  ;;  %v860_v42 = vsub.f32 2.0, %v844_v52  ;;  %v781_v37 = vadd.f32 0.49746925, %v765_v59  ;;  %v795_v10 = vmul.f32 %v779_v40, %v1568_v57 }
 0x172   : > { %v1307_v33 = vpop.eup %1306  ;;  %v919_v30 = vmul.f32 %v903_v46, %v887_v47  ;;  %v873_v51 = vsub.f32 2.0, %v857_v22  ;;  %v634_v8 = vadd.f32 1.1283791, %v618_v24  ;;  %v920_v28 = vmul.f32 %v904_v56, %v888_v6  ;;  %v2090_v46 = vld [vmem:[#allocation13_spill] sm:$0xff] }
 0x173   : > { %v858_v36 = vmul.f32 %v1307_v33, %v826_v27  ;;  %v862_v32 = vsub.f32 2.0, %v846_v35  ;;  %v876_v25 = vmul.f32 %v1301_v17, %v860_v42  ;;  %v797_v18 = vmul.f32 %v781_v37, %v1593_v11  ;;  %v2088_v17 = vld [vmem:[#allocation7_spill] sm:$0xff] }
 0x174   : > { %v889_v12 = vmul.f32 %v1303_v16, %v873_v51  ;;  %v905_v7 = vmul.f32 %v1862_v60, %v633_v0  ;;  %v811_v13 = vadd.f32 1.0, %v795_v10  ;;  %v935_v2 = vadd.f32 1.0, %v919_v30 }
 0x175   : > { %v874_v19 = vsub.f32 2.0, %v858_v36  ;;  %v878_v38 = vmul.f32 %v1305_v62, %v862_v32  ;;  %v908_v29 = vmul.f32 %v892_v1, %v876_v25  ;;  %v813_v55 = vadd.f32 1.0, %v797_v18 }
 0x176   : > { %v921_v3 = vmul.f32 %v905_v7, %v889_v12  ;;  %v906_v54 = vmul.f32 %v1874_v39, %v634_v8  ;;  %1308 = vrcp.f32 %v811_v13  ;;  %v430_v47 = vmul.f32 0.5, %v2088_v17  ;;  %v2092_v12 = vld [vmem:[#allocation10_spill] sm:$0xff] }
 0x177   : > { %v890_v26 = vmul.f32 %v1307_v33, %v874_v19  ;;  %v910_v27 = vmul.f32 %v894_v58, %v878_v38  ;;  %v924_v23 = vadd.f32 1.0, %v908_v29  ;;  %1310 = vrcp.f32 %v813_v55 }
 0x178   : > { %v439_v24 = vmul.f32 0.5, %v2089_v45  ;;  %v441_v60 = vmul.f32 0.5, %v1840_v41  ;;  %v937_v16 = vadd.f32 1.0, %v921_v3  ;;  %v587_v52 = vadd.f32 0.18520832, %v571_v44  ;;  %v2094_v3 = vld [vmem:[#allocation8_spill] sm:$0xff] }
 0x179   : > { %v936_v59 = vadd.f32 1.0, %v920_v28  ;;  %v922_v1 = vmul.f32 %v906_v54, %v890_v26  ;;  %v926_v40 = vadd.f32 1.0, %v910_v27  ;;  %v589_v62 = vadd.f32 0.18520832, %v573_v20 }
 0x17a   : > { %v951_v4 = vmul.f32 %v935_v2, %v439_v24  ;;  %v440_v39 = vmul.f32 0.5, %v2090_v46  ;;  %v953_v6 = vmul.f32 %v937_v16, %v441_v60  ;;  %v442_v58 = vmul.f32 0.5, %v1858_v31 }
 0x17b   : > { %v938_v0 = vadd.f32 1.0, %v922_v1  ;;  %v940_v22 = vmul.f32 %v924_v23, %v1968_v5  ;;  %v942_v35 = vmul.f32 %v926_v40, %v430_v47  ;;  %v603_v37 = vmul.f32 %v587_v52, %v1568_v57  ;;  %v2091_v5 = vld [vmem:[#allocation9_spill] sm:$0xff] }
 0x17c   : > { %v1234_v42 = vpack.c.bf16 %v953_v6, %v951_v4  ;;  %v952_v41 = vmul.f32 %v936_v59, %v440_v39  ;;  %v605_v33 = vmul.f32 %v589_v62, %v1593_v11  ;;  %v2093_v11 = vld [vmem:[#allocation6_spill] sm:$0xff]  ;;  %v429_v54 = vmul.f32 0.5, %v2094_v3 }
 0x17d   : > { %v954_v10 = vmul.f32 %v938_v0, %v442_v58  ;;  %v1220_v44 = vpack.c.bf16 %v942_v35, %v940_v22  ;;  %v619_v51 = vadd.f32 1.1283791, %v603_v37  ;;  %v427_v2 = vmul.f32 0.5, %v2093_v11 }
 0x17e   : > { %v621_v36 = vadd.f32 1.1283791, %v605_v33 }
 0x17f   : > { %1221 = vmatprep.subr.bf16.mxu1 %v1220_v44  ;;  %v1232_v20 = vpack.c.bf16 %v954_v10, %v952_v41  ;;  %v891_v18 = vmul.f32 %v2091_v5, %v619_v51 }
 0x180   : > { %v1309_v30 = vpop.eup %1308  ;;  %v893_v57 = vmul.f32 %v2092_v12, %v621_v36 }
 0x181   : > { %v1311_v56 = vpop.eup %1310  ;;  %v843_v8 = vmul.f32 %v1309_v30, %v811_v13 }
 0x182   : > { %v845_v31 = vmul.f32 %v1311_v56, %v813_v55 }
 0x183   : > { %v859_v32 = vsub.f32 2.0, %v843_v8 }
 0x184   : > { %v861_v25 = vsub.f32 2.0, %v845_v31 }
 0x185   : > { %v875_v28 = vmul.f32 %v1309_v30, %v859_v32 }
 0x186   : > { %v877_v7 = vmul.f32 %v1311_v56, %v861_v25 }
 0x187   : > { %v907_v19 = vmul.f32 %v891_v18, %v875_v28 }
 0x188   : > { %v909_v38 = vmul.f32 %v893_v57, %v877_v7 }
 0x189   : > { %v923_v29 = vadd.f32 1.0, %v907_v19 }
 0x18a   : > { %v925_v26 = vadd.f32 1.0, %v909_v38 }
 0x18b   : > { %v939_v27 = vmul.f32 %v923_v29, %v427_v2 }
 0x18c   : > { %v941_v13 = vmul.f32 %v925_v26, %v429_v54 }
 0x18e   : > { %v1222_v23 = vpack.c.bf16 %v941_v13, %v939_v27 }
 0x190   : > { %1223 = vmatpush1.bf16.msra.mxu1 %v1222_v23 }
 0x191   : > { %1225 = vmatprep.subr.bf16.mxu1 %v1224_v50 }
 0x194   : > { %1227 = vmatpush1.bf16.msra.mxu1 %v1226_v21 }
 0x195   : > { %1229 = vmatprep.subr.bf16.mxu1 %v1228_v15 }
 0x198   : > { %1231 = vmatpush1.bf16.msra.mxu1 %v1230_v61 }
 0x199   : > { %1233 = vmatprep.subr.bf16.mxu1 %v1232_v20 }
 0x19c   : > { %1235 = vmatpush1.bf16.msra.mxu1 %v1234_v42 }
 0x19f   : > { %1214 = vmatmul.mubr.msk.f32.vlgmr.msra.gmra.mrb[0].mxu1 %vm960_vm2, %v239_v9 }
 0x1a0   : > { %1100 = vmatprep.mubr.f32.mxu1 %v2095_v63 }
 0x272   : > { %v1030_v48 = vpop.f32.mrb[0].mxu1 }
 0x273   : > { %v1032_v43 = vpop.f32.mrb[1].mxu1  ;;  %v1031_v50 = vadd.f32 %v1030_v48, %v958_v14 }
 0x274   : > { %v1033_v53 = vadd.f32 %v1032_v43, %v958_v14 }
 0x276   : > { %1036 = vmatprep.subr.mxu1 %v1033_v53 }
 0x277   : > { %1037 = vmatpush1.xpose.msra.mxu1 %v1031_v50 }
 0x27a   : > { %1101 = vmatmul.mubr.f32.vlgmr.msra.gmra.mrb[2].mxu1 %v1312_v49 }
 0x34d   : > { %v1102_v34 = vpop.f32.mrb[2].mxu1 }
 0x34e   : > { %1107 = vst.msk [vmem:[%s217_s25] sm:$0xf] %vm1106_vm3, %v1102_v34  ;;  %v1104_v21 = vpop.f32.mrb[3].mxu1 }
 0x34f   : > { %1326 = shalt.err (!%p1323_p3)
}
 0x350   : > { %s1327_s11 = scalar_lea.hbm %s2019_s7, 64  ;;  %s1331_s15 = scalar_lea.hbm %s2066_s5, 128 }
 0x351   : > { %p1328_p4 = scmp.ne.s32.totalorder %s2019_s7, %s1327_s11  ;;  %p1332_p9 = scmp.lt.u32.totalorder %s2019_s7, %s2066_s5 }
 0x352   : > { %p1333_p10 = scmp.lt.u32.totalorder %s1331_s15, %s1327_s11  ;;  %p1335_p12 = scmp.lt.u32.totalorder %s1327_s11, %s2019_s7 }
 0x353   : > { %p1329_p7 = pnand %p1328_p4, %p1448_p5 }
 0x354   : > { %p1334_p11 = por %p1333_p10, %p1332_p9 }
 0x355   : > { %p1330_p8 = pneg %p1329_p7 }
 0x356   : > { %p1336_p13 = por %p1335_p12, %p1334_p11 }
 0x358   : > { %p1337_p0 = pnand %p1336_p13, %p1330_p8 }
 0x35a   : > { %1340 = shalt.err (!%p1337_p0)
}
 0x35b   : > { %1236 = dma.vmem_to_hbm [thread:$0]  (%p1448_p5), %s2021_s26, 64, %s2019_s7, %s1109_s13  }
 0x35c PF: > { %p1242_p1 = scmp.ge.s32.totalorder %s1375_s21, 2  ;;  %s1134_s23 = sand.u32 1, %s1363_s18  }
 0x35d   : > { %s1135_s25 = scalar_lea.sflag [#allocation3], %s1134_s23 }
 0x35e   : > { %p1239_p2 = pnand %p1242_p1, %p1452_p6 }
 0x360   : > { %1358 = dma.done.wait (!%p1239_p2), %s1135_s25, 64  }
 0x361   : > { %1360 = vsyncadd (!%p1239_p2), %s1135_s25, 4294967232  ;;  %p15_p3 = scmp.ge.s32.totalorder %s1435_s24, 4   ;;  %s2096_s18 = smov %s1367_s19 }
 0x362   : > { %s2097_s19 = smov %s1371_s20  ;;  %s2098_s20 = smov %s1446_s27 }
 0x363   : > { %s2099_s21 = smov %s1435_s24  ;;  %17 = sbr.rel (!%p15_p3) target bundleno = 3 (0x3), region = 75 }
 0x36a   :  { %1140 = vsyncpa [#allocation3], 1 }
 0x36b   :  { %1142 = vsyncpa [#allocation3 + $0x1], 1 }

</bundles_post_ra>
